<compile_context>
chip_gen: v5e
topology: v5e:2x2
jax: 0.10.0
libtpu: 0.0.40
codegen_flags: <defaults>
</compile_context>

<pallas_src>
import jax
import jax.numpy as jnp
import numpy as np
from jax.experimental import pallas as pl
from jax.experimental.pallas import tpu as pltpu  # noqa: F401  (TPU target; no TPU-specific params needed here)

# ---------------- configuration (matches the multihead_attention gen.py usage) --
B = 2                        # batch
N_HEADS = 4                  # heads
S = 8                        # sequence length
D_MODEL = 32                 # d_model (temperature = sqrt(d_model), per the module)
D_K = D_MODEL // N_HEADS     # per-head dim = 8
G = B * N_HEADS              # folded (batch, head) groups = 8
GS = G * S                   # folded rows = 64
OUT_LANES = 128              # lane-dense output slab width (unmasked vst, single DMA)

TEMPERATURE = D_MODEL ** 0.5        # NOTE: module uses d_model**0.5, not d_k**0.5
INV_TEMP = 1.0 / TEMPERATURE
NEG_BIG = -1.0e30                   # exp(NEG_BIG - m) underflows to exactly +0.0 (f32)

assert S & (S - 1) == 0, "xor block-mask trick and selector need power-of-two S"
assert D_K + S <= OUT_LANES


# ------------------------------- Pallas kernel ----------------------------------
def sdpa_kernel(qkv_ref, out_ref):
    # qkv_ref: (3, GS, D_K)  -- q / k / v slabs packed into ONE input DMA.
    # out_ref: (GS, OUT_LANES) -- single lane-dense output slab:
    #   lanes [0, D_K)       : attention output  (attn @ v)
    #   lanes [D_K, D_K + S) : compact per-row attention weights (own block only)
    #   lanes [D_K+S, 128)   : zero padding (keeps the store 128-wide / unmasked)
    q = qkv_ref[0] * INV_TEMP          # single scale of the whole Q slab (q / temperature)
    k = qkv_ref[1]
    v = qkv_ref[2]

    # One wide MXU matmul gives every (batch, head) score block at once:
    # scores[i, j] = q_i . k_j / temperature,  shape (GS, GS) = (64, 64).
    scores = jax.lax.dot_general(
        q, k, (((1,), (1,)), ((), ())), preferred_element_type=jnp.float32)

    # Block-diagonal mask: row i may only attend to columns of its own
    # (batch, head) block of S consecutive rows/cols.
    # i//S == j//S  <=>  (i ^ j) < S   (S is a power of two) -> xor + compare.
    row = jax.lax.broadcasted_iota(jnp.int32, (GS, GS), 0)
    col = jax.lax.broadcasted_iota(jnp.int32, (GS, GS), 1)
    scores = jnp.where((row ^ col) < S, scores, NEG_BIG)

    # Single batched softmax over the whole (GS, GS) slab.
    m = jnp.max(scores, axis=-1, keepdims=True)
    p = jnp.exp(scores - m)                        # masked entries -> exactly +0.0
    denom = jnp.sum(p, axis=-1, keepdims=True)     # in [1, S]: well conditioned
    inv = pl.reciprocal(denom, approx=True)        # EUP slot (off the VALU)
    inv = inv * (2.0 - denom * inv)                # one Newton step -> ~f32 exact
    p = p * inv                                    # (GS, GS), exactly block-diagonal

    # Selector matrix E[j, c] = 1.0 iff (j mod S) == c.  Since off-block p is
    # exactly zero, (p @ E)[i, c] == p[i, block(i)*S + c]: the compact per-head
    # attention weights, extracted on the (otherwise idle) MXU — no wrapper gather.
    jrow = jax.lax.broadcasted_iota(jnp.int32, (GS, S), 0)
    jcol = jax.lax.broadcasted_iota(jnp.int32, (GS, S), 1)
    sel = jnp.where((jrow & (S - 1)) == jcol, 1.0, 0.0).astype(jnp.float32)   # (GS, S)

    # One matmul produces both results:
    #   lanes [0, D_K)       = attn @ v
    #   lanes [D_K, D_K + S) = compact attention weights
    v_and_sel = jnp.concatenate([v, sel], axis=1)                  # (GS, D_K + S)
    res = jnp.dot(p, v_and_sel, preferred_element_type=jnp.float32)

    # Pad to a full 128-lane slab: ONE whole-ref, unmasked, lane-dense store.
    pad = jnp.zeros((GS, OUT_LANES - (D_K + S)), jnp.float32)
    out_ref[...] = jnp.concatenate([res, pad], axis=1)


# ------------------------------- wrapper -----------------------------------------
def scaled_dot_product_attention(q, k, v):
    """q, k, v: (B, N_HEADS, S, D_K) float32.

    Returns (output, attn) with shapes (B, N_HEADS, S, D_K) and (B, N_HEADS, S, S),
    matching the PyTorch module's forward.
    """
    assert q.shape == (B, N_HEADS, S, D_K)

    # Pack q/k/v into ONE (3, GS, D_K) slab -> a single input DMA pipeline.
    qkv = jnp.stack(
        [q.reshape(GS, D_K), k.reshape(GS, D_K), v.reshape(GS, D_K)], axis=0)

    # No grid / no BlockSpecs: single invocation, whole arrays staged in VMEM
    # (removes the 1-step grid scaffolding and per-step pipeline overhead).
    slab = pl.pallas_call(
        sdpa_kernel,
        out_shape=jax.ShapeDtypeStruct((GS, OUT_LANES), jnp.float32),
    )(qkv)

    # Wrapper side is pure layout plumbing: static slices + reshapes only.
    output = slab[:, :D_K].reshape(B, N_HEADS, S, D_K)
    attn = slab[:, D_K:D_K + S].reshape(B, N_HEADS, S, S)
    return output, attn


attention_jit = jax.jit(scaled_dot_product_attention)


# --------------------------- pure-JAX reference ----------------------------------
def reference(q, k, v):
    attn = jnp.einsum("bhqd,bhkd->bhqk", q / TEMPERATURE, k)
    attn = jax.nn.softmax(attn, axis=-1)
    out = jnp.einsum("bhqk,bhkd->bhqd", attn, v)
    return out, attn


# ------------------------------------ main ----------------------------------------
if __name__ == "__main__":
    root = jax.random.PRNGKey(0)
    kq, kk, kv = jax.random.split(root, 3)
    q = jax.random.normal(kq, (B, N_HEADS, S, D_K), jnp.float32)
    k = jax.random.normal(kk, (B, N_HEADS, S, D_K), jnp.float32)
    v = jax.random.normal(kv, (B, N_HEADS, S, D_K), jnp.float32)

    out, attn = attention_jit(q, k, v)
    jax.block_until_ready((out, attn))

    ref_out, ref_attn = reference(q, k, v)
    np.testing.assert_allclose(np.asarray(out), np.asarray(ref_out), rtol=1e-4, atol=1e-5)
    np.testing.assert_allclose(np.asarray(attn), np.asarray(ref_attn), rtol=1e-4, atol=1e-5)

    print("KERNEL_OK")
</pallas_src>

<mosaic_0001>
module attributes {stable_mosaic.version = 11 : i64} {
  func.func @sdpa_kernel(%arg0: memref<3x64x8xf32, #tpu.memory_space<vmem>>, %arg1: memref<64x128xf32, #tpu.memory_space<vmem>>) attributes {dimension_semantics = [], scalar_prefetch = 0 : i64, scratch_operands = 0 : i64, tpu.core_type = #tpu.core_type<tc>} {
    %c0 = arith.constant 0 : index
    %c0_0 = arith.constant 0 : index
    %c0_1 = arith.constant 0 : index
    %0 = vector.load %arg0[%c0, %c0_0, %c0_1] : memref<3x64x8xf32, #tpu.memory_space<vmem>>, vector<1x64x8xf32>
    %1 = vector.shape_cast %0 : vector<1x64x8xf32> to vector<64x8xf32>
    %cst = arith.constant 0.176776692 : f32
    %2 = vector.broadcast %cst : f32 to vector<64x8xf32>
    %3 = arith.mulf %1, %2 : vector<64x8xf32>
    %c1 = arith.constant 1 : index
    %c0_2 = arith.constant 0 : index
    %c0_3 = arith.constant 0 : index
    %4 = vector.load %arg0[%c1, %c0_2, %c0_3] : memref<3x64x8xf32, #tpu.memory_space<vmem>>, vector<1x64x8xf32>
    %5 = vector.shape_cast %4 : vector<1x64x8xf32> to vector<64x8xf32>
    %c2 = arith.constant 2 : index
    %c0_4 = arith.constant 0 : index
    %c0_5 = arith.constant 0 : index
    %6 = vector.load %arg0[%c2, %c0_4, %c0_5] : memref<3x64x8xf32, #tpu.memory_space<vmem>>, vector<1x64x8xf32>
    %7 = vector.shape_cast %6 : vector<1x64x8xf32> to vector<64x8xf32>
    %cst_6 = arith.constant dense<0.000000e+00> : vector<64x64xf32>
    %8 = tpu.matmul %3, %5, %cst_6 {dimension_numbers = #tpu.dot_dimension_numbers<[1], [1], [0], [0], [0, 0, 1, 0], [], []>} : vector<64x8xf32>, vector<64x8xf32>, vector<64x64xf32> -> vector<64x64xf32>
    %9 = tpu.iota {dimensions = array<i32: 0>} : vector<64x64xi32>
    %10 = tpu.iota {dimensions = array<i32: 1>} : vector<64x64xi32>
    %11 = arith.xori %9, %10 : vector<64x64xi32>
    %c8_i32 = arith.constant 8 : i32
    %12 = vector.broadcast %c8_i32 : i32 to vector<64x64xi32>
    %13 = arith.cmpi slt, %11, %12 : vector<64x64xi32>
    %cst_7 = arith.constant -1.000000e+30 : f32
    %14 = vector.broadcast %cst_7 : f32 to vector<64x64xf32>
    %15 = arith.select %13, %8, %14 : vector<64x64xi1>, vector<64x64xf32>
    %cst_8 = arith.constant dense<0xFF800000> : vector<64xf32>
    %16 = vector.multi_reduction <maximumf>, %15, %cst_8 [1] : vector<64x64xf32> to vector<64xf32>
    %17 = vector.shape_cast %16 : vector<64xf32> to vector<64x1xf32>
    %18 = vector.broadcast %17 : vector<64x1xf32> to vector<64x64xf32>
    %19 = arith.subf %15, %18 : vector<64x64xf32>
    %20 = math.exp %19 : vector<64x64xf32>
    %cst_9 = arith.constant dense<0.000000e+00> : vector<64xf32>
    %21 = vector.multi_reduction <add>, %20, %cst_9 [1] : vector<64x64xf32> to vector<64xf32>
    %22 = vector.shape_cast %21 : vector<64xf32> to vector<64x1xf32>
    %23 = tpu.reciprocal %22 {approx = true} : vector<64x1xf32> -> vector<64x1xf32>
    %24 = arith.mulf %22, %23 : vector<64x1xf32>
    %cst_10 = arith.constant 2.000000e+00 : f32
    %25 = vector.broadcast %cst_10 : f32 to vector<64x1xf32>
    %26 = arith.subf %25, %24 : vector<64x1xf32>
    %27 = arith.mulf %23, %26 : vector<64x1xf32>
    %28 = vector.broadcast %27 : vector<64x1xf32> to vector<64x64xf32>
    %29 = arith.mulf %20, %28 : vector<64x64xf32>
    %30 = tpu.iota {dimensions = array<i32: 0>} : vector<64x8xi32>
    %31 = tpu.iota {dimensions = array<i32: 1>} : vector<64x8xi32>
    %c7_i32 = arith.constant 7 : i32
    %32 = vector.broadcast %c7_i32 : i32 to vector<64x8xi32>
    %33 = arith.andi %30, %32 : vector<64x8xi32>
    %34 = arith.cmpi eq, %33, %31 : vector<64x8xi32>
    %cst_11 = arith.constant 1.000000e+00 : f32
    %cst_12 = arith.constant 0.000000e+00 : f32
    %35 = vector.broadcast %cst_11 : f32 to vector<64x8xf32>
    %36 = vector.broadcast %cst_12 : f32 to vector<64x8xf32>
    %37 = arith.select %34, %35, %36 : vector<64x8xi1>, vector<64x8xf32>
    %38 = tpu.concatenate %7, %37 in 1 : vector<64x8xf32>, vector<64x8xf32> -> vector<64x16xf32>
    %cst_13 = arith.constant dense<0.000000e+00> : vector<64x16xf32>
    %39 = tpu.matmul %29, %38, %cst_13 {dimension_numbers = #tpu.dot_dimension_numbers<[1], [0], [0], [1], [0, 0, 1, 1], [], []>} : vector<64x64xf32>, vector<64x16xf32>, vector<64x16xf32> -> vector<64x16xf32>
    %cst_14 = arith.constant 0.000000e+00 : f32
    %40 = vector.broadcast %cst_14 : f32 to vector<64x112xf32>
    %41 = tpu.concatenate %39, %40 in 1 : vector<64x16xf32>, vector<64x112xf32> -> vector<64x128xf32>
    %c0_15 = arith.constant 0 : index
    %c0_16 = arith.constant 0 : index
    %42 = vector.load %arg1[%c0_15, %c0_16] : memref<64x128xf32, #tpu.memory_space<vmem>>, vector<64x128xf32>
    tpu.vector_store %arg1[%c0_15, %c0_16], %41 {strides = array<i32>} : memref<64x128xf32, #tpu.memory_space<vmem>>, vector<64x128xf32>,
    return
  }
}

</mosaic_0001>

<bundles_post_ra>
// kernel: scaled_dot_product_attention.1
= control target key start
LH: loop header
LB: loop body
LE: loop exit
PB: predicated region body
PF: predicated region fallthrough
CT: control target
= control target key end

     0   :  { %vm42_vm0 = vcmask 64512   ;;  %v132_v24 = vlaneseq  ;;  %vm167_vm2 = vcmask 523264   ;;  %s541_s9 = smov 8   ;;  %s813_s0 = inlined_call_operand.vmem [shape: f32[3,64,8], index: 0, kind: input, shape index: {}]   ;;  %s814_s1 = inlined_call_operand.vmem [shape: f32[64,128], index: 1, kind: output, shape index: {}]  }
   0x1   :  { %v437_v0 = vld [vmem:[%s813_s0 + $0x78] sm:$0xff]  ;;  %v436_v1 = vld [vmem:[%s813_s0 + $0x70] sm:$0xff]  ;;  %v435_v2 = vld [vmem:[%s813_s0 + $0x68] sm:$0xff] }
   0x2   :  { %446 = vmatpush.xpose.msk.msra.mxu0 %vm42_vm0, %v437_v0  ;;  %470 = vmatpush.xpose.msk.msra.mxu2 %vm42_vm0, %v437_v0  ;;  %v434_v3 = vld [vmem:[%s813_s0 + $0x60] sm:$0xff]  ;;  %v433_v4 = vld [vmem:[%s813_s0 + $0x58] sm:$0xff]  ;;  %v432_v5 = vld [vmem:[%s813_s0 + $0x50] sm:$0xff]  ;;  %v624_v25 = vshrl.u32 %v132_v24, 7  ;;  %v626_v26 = vand.u32 127, %v132_v24 }
   0x3   :  { %v431_v6 = vld [vmem:[%s813_s0 + $0x48] sm:$0xff]  ;;  %v8_v7 = vld [vmem:[%s813_s0] sm:$0xff]  ;;  %v11_v8 = vld [vmem:[%s813_s0 + $0x18] sm:$0xff] }
   0x4   :  { %v430_v9 = vld [vmem:[%s813_s0 + $0x40] sm:$0xff]  ;;  %v16_v10 = vmul.f32 0.17677669, %v8_v7  ;;  %v19_v11 = vmul.f32 0.17677669, %v11_v8  ;;  %v9_v12 = vld [vmem:[%s813_s0 + $0x8] sm:$0xff]  ;;  %v143_v27 = vxor.u32 %v626_v26, %v624_v25 }
   0x5   :  { %v12_v13 = vld [vmem:[%s813_s0 + $0x20] sm:$0xff]  ;;  %v17_v14 = vmul.f32 0.17677669, %v9_v12  ;;  %v13_v16 = vld [vmem:[%s813_s0 + $0x28] sm:$0xff]  ;;  %v10_v17 = vld [vmem:[%s813_s0 + $0x10] sm:$0xff]  ;;  %v631_v28 = vadd.s32 24, %v624_v25 }
   0x6   :  { %447 = vmatpush.xpose.msk.msra.mxu0 %vm42_vm0, %v436_v1  ;;  %471 = vmatpush.xpose.msk.msra.mxu2 %vm42_vm0, %v436_v1  ;;  %v20_v15 = vmul.f32 0.17677669, %v12_v13  ;;  %v21_v18 = vmul.f32 0.17677669, %v13_v16  ;;  %v18_v19 = vmul.f32 0.17677669, %v10_v17 }
   0x7   :  { %v14_v20 = vld [vmem:[%s813_s0 + $0x30] sm:$0xff]  ;;  %v15_v22 = vld [vmem:[%s813_s0 + $0x38] sm:$0xff]  ;;  %vm151_vm1 = vcmp.lt.s32.totalorder %v143_v27, 8  ;;  %v634_v29 = vadd.s32 8, %v624_v25  ;;  %v146_v31 = vxor.u32 %v626_v26, %v631_v28  ;;  %v137_v35 = vadd.s32 32, %v624_v25 }
   0x8   :  { %v22_v21 = vmul.f32 0.17677669, %v14_v20  ;;  %v23_v23 = vmul.f32 0.17677669, %v15_v22  ;;  %v135_v41 = vadd.s32 16, %v624_v25  ;;  %v138_v49 = vadd.s32 40, %v624_v25 }
   0x9   :  { %v144_v34 = vxor.u32 %v626_v26, %v634_v29  ;;  %vm154_vm3 = vcmp.lt.s32.totalorder %v146_v31, 8  ;;  %v147_v40 = vxor.u32 %v626_v26, %v137_v35  ;;  %v139_v52 = vadd.s32 48, %v624_v25 }
   0xa   :  { %448 = vmatpush.xpose.msk.msra.mxu0 %vm42_vm0, %v435_v2  ;;  %472 = vmatpush.xpose.msk.msra.mxu2 %vm42_vm0, %v435_v2  ;;  %v145_v44 = vxor.u32 %v626_v26, %v135_v41  ;;  %v148_v51 = vxor.u32 %v626_v26, %v138_v49  ;;  %v140_v57 = vadd.s32 56, %v624_v25  ;;  %v283_v2 = vand.u32 7, %v631_v28 }
   0xb   :  { %vm152_vm4 = vcmp.lt.s32.totalorder %v144_v34, 8  ;;  %vm155_vm5 = vcmp.lt.s32.totalorder %v147_v40, 8  ;;  %v149_v55 = vxor.u32 %v626_v26, %v139_v52  ;;  %v540_v8 = vmov 0.0  }
   0xc   :  { %vm153_vm6 = vcmp.lt.s32.totalorder %v145_v44, 8  ;;  %vm156_vm7 = vcmp.lt.s32.totalorder %v148_v51, 8  ;;  %v150_v62 = vxor.u32 %v626_v26, %v140_v57  ;;  %v287_v7 = vand.u32 7, %v140_v57 }
   0xd   :  { %vm157_vm8 = vcmp.lt.s32.totalorder %v149_v55, 8  ;;  %vm291_vm11 = vcmp.eq.s32.totalorder %v283_v2, %v626_v26 }
   0xe   :  { %449 = vmatpush.xpose.msk.msra.mxu0 %vm42_vm0, %v434_v3  ;;  %473 = vmatpush.xpose.msk.msra.mxu2 %vm42_vm0, %v434_v3  ;;  %vm158_vm9 = vcmp.lt.s32.totalorder %v150_v62, 8  ;;  %v282_v3 = vand.u32 7, %v135_v41  ;;  %vm295_vm15 = vcmp.eq.s32.totalorder %v287_v7, %v626_v26  ;;  %v443_v7 = vld [vmem:[%s813_s0 + $0xa8] sm:$0xff] }
  0x10   :  { %vm290_vm10 = vcmp.eq.s32.totalorder %v282_v3, %v626_v26 }
  0x12   :  { %450 = vmatpush.xpose.msk.msra.mxu0 %vm42_vm0, %v433_v4  ;;  %474 = vmatpush.xpose.msk.msra.mxu2 %vm42_vm0, %v433_v4  ;;  %v284_v4 = vand.u32 7, %v137_v35 }
  0x14   :  { %vm292_vm12 = vcmp.eq.s32.totalorder %v284_v4, %v626_v26 }
  0x16   :  { %451 = vmatpush.xpose.msk.msra.mxu0 %vm42_vm0, %v432_v5  ;;  %475 = vmatpush.xpose.msk.msra.mxu2 %vm42_vm0, %v432_v5  ;;  %v285_v5 = vand.u32 7, %v138_v49 }
  0x18   :  { %vm293_vm13 = vcmp.eq.s32.totalorder %v285_v5, %v626_v26 }
  0x19   :  { %v301_v12 = vsel %vm293_vm13, 1.0, %v540_v8 }
  0x1a   :  { %452 = vmatpush.xpose.msk.msra.mxu0 %vm42_vm0, %v431_v6  ;;  %476 = vmatpush.xpose.msk.msra.mxu2 %vm42_vm0, %v431_v6  ;;  %v286_v6 = vand.u32 7, %v139_v52 }
  0x1c   :  { %vm294_vm14 = vcmp.eq.s32.totalorder %v286_v6, %v626_v26 }
  0x1e   :  { %453 = vmatpush.xpose.msk.msra.mxu0 %vm42_vm0, %v430_v9  ;;  %477 = vmatpush.xpose.msk.msra.mxu2 %vm42_vm0, %v430_v9  ;;  %v298_v9 = vsel %vm290_vm10, 1.0, %v540_v8 }
  0x21   :  { %454 = vmatmul.msk.f32.vlgmr.msra.gmra.mxu0 %vm42_vm0, %v16_v10  ;;  %457 = vmatmul.msk.f32.vlgmr.msra.gmra.mxu2 %vm42_vm0, %v19_v11  ;;  %v299_v10 = vsel %vm291_vm11, 1.0, %v540_v8  ;;  %v300_v11 = vsel %vm292_vm12, 1.0, %v540_v8 }
  0x22   :  { %v498_v13 = vpack.i.bf16 %v298_v9, %v299_v10  ;;  %v493_v16 = vpack.i.bf16 %v300_v11, %v301_v12  ;;  %v442_v11 = vld [vmem:[%s813_s0 + $0xa0] sm:$0xff] }
  0x29   :  { %455 = vmatmul.msk.f32.gmra.mxu0 %vm42_vm0, %v17_v14  ;;  %458 = vmatmul.msk.f32.gmra.mxu2 %vm42_vm0, %v20_v15  ;;  %v302_v14 = vsel %vm294_vm14, 1.0, %v540_v8  ;;  %v303_v15 = vsel %vm295_vm15, 1.0, %v540_v8 }
  0x2a   :  { %v488_v17 = vpack.i.bf16 %v302_v14, %v303_v15  ;;  %v441_v14 = vld [vmem:[%s813_s0 + $0x98] sm:$0xff] }
  0x31   :  { %459 = vmatmul.msk.f32.gmra.mxu2 %vm42_vm0, %v21_v18  ;;  %456 = vmatmul.msk.f32.gmra.mxu0 %vm42_vm0, %v18_v19  ;;  %v281_v18 = vand.u32 7, %v634_v29  ;;  %v280_v19 = vand.u32 7, %v624_v25 }
  0x39   :  { %460 = vmatmul.msk.f32.gmra.mxu2 %vm42_vm0, %v22_v21 }
  0x41   :  { %461 = vmatmul.msk.f32.gmra.mxu2 %vm42_vm0, %v23_v23 }
  0x9e   :  { %v108_v30 = vpop.f32.mrf.mxu0 }
  0x9f   :  { %v638_v32 = vsel %vm151_vm1, %v108_v30, -1e+30  ;;  %vm288_vm1 = vcmp.eq.s32.totalorder %v280_v19, %v626_v26 }
  0xa0   :  { %v168_v33 = vsel %vm167_vm2, %v638_v32, -inf  ;;  %v296_v20 = vsel %vm288_vm1, 1.0, %v540_v8 }
  0xa1   :  { %169 = vmax.xlane.f32.xlu0 %v168_v33 }
  0xa4   :  { %v117_v36 = vpop.f32.mrf.mxu2 }
  0xa5   :  { %v645_v37 = vsel %vm154_vm3, %v117_v36, -1e+30  ;;  %vm289_vm3 = vcmp.eq.s32.totalorder %v281_v18, %v626_v26 }
  0xa6   :  { %v111_v38 = vpop.f32.mrf.mxu0  ;;  %v177_v39 = vsel %vm167_vm2, %v645_v37, -inf  ;;  %v297_v21 = vsel %vm289_vm3, 1.0, %v540_v8 }
  0xa7   :  { %v651_v42 = vsel %vm152_vm4, %v111_v38, -1e+30  ;;  %178 = vmax.xlane.f32.xlu2 %v177_v39  ;;  %v503_v22 = vpack.i.bf16 %v296_v20, %v297_v21  ;;  %v439_v21 = vld [vmem:[%s813_s0 + $0x88] sm:$0xff] }
  0xa8   :  { %v171_v43 = vsel %vm167_vm2, %v651_v42, -inf }
  0xa9   :  { %172 = vmax.xlane.f32.xlu0 %v171_v43 }
  0xac   :  { %v120_v45 = vpop.f32.mrf.mxu2 }
  0xad   :  { %v656_v46 = vsel %vm155_vm5, %v120_v45, -1e+30 }
  0xae   :  { %v180_v47 = vsel %vm167_vm2, %v656_v46, -inf  ;;  %v114_v48 = vpop.f32.mrf.mxu0 }
  0xaf   :  { %181 = vmax.xlane.f32.xlu1 %v180_v47  ;;  %v661_v50 = vsel %vm153_vm6, %v114_v48, -1e+30 }
  0xb0   :  { %v174_v54 = vsel %vm167_vm2, %v661_v50, -inf }
  0xb4   :  { %v123_v53 = vpop.f32.mrf.mxu2 }
  0xb5   :  { %v668_v56 = vsel %vm156_vm7, %v123_v53, -1e+30 }
  0xb6   :  { %v183_v59 = vsel %vm167_vm2, %v668_v56, -inf }
  0xb7   :  { %175 = vmax.xlane.f32.xlu1 %v174_v54 }
  0xbc   :  { %v126_v58 = vpop.f32.mrf.mxu2 }
  0xbd   :  { %v673_v60 = vsel %vm157_vm8, %v126_v58, -1e+30 }
  0xbe   :  { %v186_v61 = vsel %vm167_vm2, %v673_v60, -inf }
  0xbf   :  { %187 = vmax.xlane.f32.xlu2 %v186_v61  ;;  %184 = vmax.xlane.f32.xlu1 %v183_v59 }
  0xc4   :  { %v129_v63 = vpop.f32.mrf.mxu2 }
  0xc5   :  { %v678_v0 = vsel %vm158_vm9, %v129_v63, -1e+30 }
  0xc6   :  { %v189_v1 = vsel %vm167_vm2, %v678_v0, -inf }
  0xc7   :  { %190 = vmax.xlane.f32.xlu0 %v189_v1  ;;  %v444_v1 = vld [vmem:[%s813_s0 + $0xb0] sm:$0xff] }
  0xd7   :  { %499 = vrot.lane.b32.xlu2 %v498_v13, %s541_s9 }
  0xd8   :  { %494 = vrot.lane.b32.xlu1 %v493_v16, %s541_s9 }
  0xdb   :  { %489 = vrot.lane.b32.xlu0 %v488_v17, %s541_s9  ;;  %v440_v17 = vld [vmem:[%s813_s0 + $0x90] sm:$0xff] }
  0xe0   :  { %504 = vrot.lane.b32.xlu1 %v503_v22, %s541_s9  ;;  %v438_v22 = vld [vmem:[%s813_s0 + $0x80] sm:$0xff] }
 0x114   :  { %v170_v23 = vpop.xlane.xlu0 %169 }
 0x115   :  { %v192_v24 = vsub.f32 %v638_v32, %v170_v23 }
 0x117   :  { %v200_v27 = vmul.f32 1.442695, %v192_v24 }
 0x119   :  { %508 = vpow2.f32 %v200_v27 }
 0x11a   :  { %v179_v32 = vpop.xlane.xlu2 %178 }
 0x11b   :  { %v195_v49 = vsub.f32 %v645_v37, %v179_v32 }
 0x11c   :  { %v173_v28 = vpop.xlane.xlu0 %172 }
 0x11d   :  { %v193_v30 = vsub.f32 %v651_v42, %v173_v28 }
 0x11f   :  { %v695_v31 = vpop.eup %508  ;;  %v202_v29 = vmul.f32 1.442695, %v193_v30 }
 0x120   :  { %v216_v25 = vsel %vm167_vm2, %v695_v31, 0.0 }
 0x121   :  { %510 = vpow2.f32 %v202_v29  ;;  %217 = vadd.xlane.f32.xlu2 %v216_v25 }
 0x122   :  { %v182_v26 = vpop.xlane.xlu1 %181 }
 0x123   :  { %v196_v38 = vsub.f32 %v656_v46, %v182_v26  ;;  %v206_v46 = vmul.f32 1.442695, %v195_v49 }
 0x125   :  { %v208_v40 = vmul.f32 1.442695, %v196_v38 }
 0x127   :  { %v699_v33 = vpop.eup %510 }
 0x128   :  { %v219_v34 = vsel %vm167_vm2, %v699_v33, 0.0 }
 0x129   :  { %220 = vadd.xlane.f32.xlu2 %v219_v34 }
 0x12a   :  { %v176_v35 = vpop.xlane.xlu1 %175 }
 0x12b   :  { %v194_v36 = vsub.f32 %v661_v50, %v176_v35 }
 0x12d   :  { %v204_v39 = vmul.f32 1.442695, %v194_v36 }
 0x12f   :  { %512 = vpow2.f32 %v204_v39 }
 0x130   :  { %514 = vpow2.f32 %v208_v40 }
 0x132   :  { %v188_v41 = vpop.xlane.xlu2 %187  ;;  %v185_v42 = vpop.xlane.xlu1 %184 }
 0x133   :  { %v198_v43 = vsub.f32 %v673_v60, %v188_v41  ;;  %v197_v44 = vsub.f32 %v668_v56, %v185_v42 }
 0x135   :  { %v707_v45 = vpop.eup %512  ;;  %v212_v47 = vmul.f32 1.442695, %v198_v43  ;;  %v210_v48 = vmul.f32 1.442695, %v197_v44 }
 0x136   :  { %v222_v50 = vsel %vm167_vm2, %v707_v45, 0.0  ;;  %v712_v51 = vpop.eup %514 }
 0x137   :  { %516 = vpow2.f32 %v212_v47  ;;  %223 = vadd.xlane.f32.xlu2 %v222_v50  ;;  %v228_v56 = vsel %vm167_vm2, %v712_v51, 0.0 }
 0x138   :  { %518 = vpow2.f32 %v210_v48 }
 0x139   :  { %520 = vpow2.f32 %v206_v46 }
 0x13a   :  { %v191_v52 = vpop.xlane.xlu0 %190  ;;  %v500_v6 = vpop.permute.xlu2 %499 }
 0x13b   :  { %v199_v55 = vsub.f32 %v678_v0, %v191_v52  ;;  %v445_v0 = vld [vmem:[%s813_s0 + $0xb8] sm:$0xff]  ;;  %v501_v12 = vunpack.i.l.bf16 %v500_v6  ;;  %v502_v15 = vunpack.i.h.bf16 %v500_v6 }
 0x13d   :  { %v714_v53 = vpop.eup %516  ;;  %v214_v58 = vmul.f32 1.442695, %v199_v55  ;;  %v339_v18 = vsel %vm42_vm0, %v441_v14, %v501_v12  ;;  %v338_v19 = vsel %vm42_vm0, %v440_v17, %v502_v15 }
 0x13e   :  { %v716_v54 = vpop.eup %518  ;;  %v234_v37 = vsel %vm167_vm2, %v714_v53, 0.0 }
 0x13f   :  { %235 = vadd.xlane.f32.xlu1 %v234_v37  ;;  %229 = vadd.xlane.f32.xlu2 %v228_v56  ;;  %v231_v57 = vsel %vm167_vm2, %v716_v54, 0.0  ;;  %v725_v59 = vpop.eup %520  ;;  %522 = vpow2.f32 %v214_v58 }
 0x140   :  { %232 = vadd.xlane.f32.xlu0 %v231_v57  ;;  %v225_v60 = vsel %vm167_vm2, %v725_v59, 0.0 }
 0x145   :  { %v729_v62 = vpop.eup %522 }
 0x146   :  { %v237_v5 = vsel %vm167_vm2, %v729_v62, 0.0 }
 0x148   :  { %226 = vadd.xlane.f32.xlu0 %v225_v60 }
 0x14a   :  { %v495_v61 = vpop.permute.xlu1 %494 }
 0x14b   :  { %v496_v4 = vunpack.i.l.bf16 %v495_v61  ;;  %v497_v9 = vunpack.i.h.bf16 %v495_v61 }
 0x14d   :  { %v490_v63 = vpop.permute.xlu0 %489  ;;  %v341_v13 = vsel %vm42_vm0, %v443_v7, %v496_v4  ;;  %v340_v16 = vsel %vm42_vm0, %v442_v11, %v497_v9 }
 0x14e   :  { %v492_v2 = vunpack.i.h.bf16 %v490_v63  ;;  %v491_v3 = vunpack.i.l.bf16 %v490_v63 }
 0x150   :  { %238 = vadd.xlane.f32.xlu0 %v237_v5  ;;  %v343_v8 = vsel %vm42_vm0, %v445_v0, %v491_v3  ;;  %v342_v10 = vsel %vm42_vm0, %v444_v1, %v492_v2 }
 0x151   :  { %376 = vmatpush.msra.mxu1 %v343_v8  ;;  %478 = vmatpush.msra.mxu3 %v343_v8 }
 0x152   :  { %v505_v20 = vpop.permute.xlu1 %504 }
 0x153   :  { %377 = vmatpush.msra.mxu1 %v342_v10  ;;  %479 = vmatpush.msra.mxu3 %v342_v10  ;;  %v507_v23 = vunpack.i.h.bf16 %v505_v20  ;;  %v506_v24 = vunpack.i.l.bf16 %v505_v20 }
 0x155   :  { %378 = vmatpush.msra.mxu1 %v341_v13  ;;  %480 = vmatpush.msra.mxu3 %v341_v13  ;;  %v337_v27 = vsel %vm42_vm0, %v439_v21, %v506_v24  ;;  %v336_v28 = vsel %vm42_vm0, %v438_v22, %v507_v23  ;;  %vm409_vm0 = vcmask 130048  }
 0x157   :  { %379 = vmatpush.msra.mxu1 %v340_v16  ;;  %481 = vmatpush.msra.mxu3 %v340_v16 }
 0x159   :  { %380 = vmatpush.msra.mxu1 %v339_v18  ;;  %482 = vmatpush.msra.mxu3 %v339_v18 }
 0x15b   :  { %381 = vmatpush.msra.mxu1 %v338_v19  ;;  %483 = vmatpush.msra.mxu3 %v338_v19 }
 0x15d   :  { %382 = vmatpush.msra.mxu1 %v337_v27  ;;  %484 = vmatpush.msra.mxu3 %v337_v27 }
 0x15f   :  { %383 = vmatpush.msra.mxu1 %v336_v28  ;;  %485 = vmatpush.msra.mxu3 %v336_v28 }
 0x194   :  { %v218_v30 = vpop.xlane.xlu2 %217 }
 0x195   :  { %524 = vrcp.f32 %v218_v30 }
 0x19b   :  { %v525_v29 = vpop.eup %524 }
 0x19c   :  { %v248_v25 = vmul.f32 %v525_v29, %v218_v30  ;;  %v221_v26 = vpop.xlane.xlu2 %220 }
 0x19d   :  { %526 = vrcp.f32 %v221_v26 }
 0x19e   :  { %v256_v34 = vsub.f32 2.0, %v248_v25 }
 0x1a0   :  { %v264_v32 = vmul.f32 %v525_v29, %v256_v34 }
 0x1a2   :  { %v272_v35 = vmul.f32 %v695_v31, %v264_v32 }
 0x1a3   :  { %v527_v36 = vpop.eup %526 }
 0x1a4   :  { %v249_v38 = vmul.f32 %v527_v36, %v221_v26  ;;  %462 = vmatmul.msk.f32.vlgmr.msra.gmra.mxu1 %vm167_vm2, %v272_v35 }
 0x1a6   :  { %v257_v39 = vsub.f32 2.0, %v249_v38 }
 0x1a8   :  { %v265_v40 = vmul.f32 %v527_v36, %v257_v39 }
 0x1aa   :  { %v224_v41 = vpop.xlane.xlu2 %223  ;;  %v273_v42 = vmul.f32 %v699_v33, %v265_v40 }
 0x1ab   :  { %528 = vrcp.f32 %v224_v41 }
 0x1ac   :  { %463 = vmatmul.msk.f32.gmra.mxu1 %vm167_vm2, %v273_v42 }
 0x1b1   :  { %v529_v43 = vpop.eup %528 }
 0x1b2   :  { %v250_v44 = vmul.f32 %v529_v43, %v224_v41  ;;  %v236_v47 = vpop.xlane.xlu1 %235  ;;  %v230_v50 = vpop.xlane.xlu2 %229 }
 0x1b3   :  { %v233_v48 = vpop.xlane.xlu0 %232 }
 0x1b4   :  { %v258_v49 = vsub.f32 2.0, %v250_v44  ;;  %530 = vrcp.f32 %v233_v48 }
 0x1b5   :  { %532 = vrcp.f32 %v236_v47 }
 0x1b6   :  { %v266_v31 = vmul.f32 %v529_v43, %v258_v49  ;;  %534 = vrcp.f32 %v230_v50 }
 0x1b8   :  { %v274_v46 = vmul.f32 %v707_v45, %v266_v31 }
 0x1ba   :  { %v531_v52 = vpop.eup %530  ;;  %464 = vmatmul.msk.f32.gmra.mxu1 %vm167_vm2, %v274_v46 }
 0x1bb   :  { %v533_v55 = vpop.eup %532  ;;  %v253_v33 = vmul.f32 %v531_v52, %v233_v48  ;;  %v227_v37 = vpop.xlane.xlu0 %226 }
 0x1bc   :  { %536 = vrcp.f32 %v227_v37  ;;  %v254_v57 = vmul.f32 %v533_v55, %v236_v47  ;;  %v535_v60 = vpop.eup %534 }
 0x1bd   :  { %v261_v56 = vsub.f32 2.0, %v253_v33  ;;  %v252_v45 = vmul.f32 %v535_v60, %v230_v50 }
 0x1be   :  { %v262_v61 = vsub.f32 2.0, %v254_v57 }
 0x1bf   :  { %v269_v58 = vmul.f32 %v531_v52, %v261_v56  ;;  %v260_v6 = vsub.f32 2.0, %v252_v45 }
 0x1c0   :  { %v270_v3 = vmul.f32 %v533_v55, %v262_v61 }
 0x1c1   :  { %v277_v63 = vmul.f32 %v716_v54, %v269_v58  ;;  %v268_v54 = vmul.f32 %v535_v60, %v260_v6 }
 0x1c2   :  { %v537_v0 = vpop.eup %536  ;;  %v278_v8 = vmul.f32 %v714_v53, %v270_v3 }
 0x1c3   :  { %v251_v1 = vmul.f32 %v537_v0, %v227_v37  ;;  %v239_v2 = vpop.xlane.xlu0 %238  ;;  %467 = vmatmul.msk.f32.vlgmr.msra.gmra.mxu3 %vm167_vm2, %v277_v63  ;;  %v276_v13 = vmul.f32 %v712_v51, %v268_v54 }
 0x1c4   :  { %538 = vrcp.f32 %v239_v2 }
 0x1c5   :  { %v259_v4 = vsub.f32 2.0, %v251_v1 }
 0x1c7   :  { %v267_v5 = vmul.f32 %v537_v0, %v259_v4 }
 0x1c9   :  { %v275_v7 = vmul.f32 %v725_v59, %v267_v5 }
 0x1ca   :  { %v539_v9 = vpop.eup %538 }
 0x1cb   :  { %v255_v10 = vmul.f32 %v539_v9, %v239_v2  ;;  %465 = vmatmul.msk.f32.gmra.mxu1 %vm167_vm2, %v275_v7  ;;  %468 = vmatmul.msk.f32.gmra.mxu3 %vm167_vm2, %v278_v8 }
 0x1cd   :  { %v263_v11 = vsub.f32 2.0, %v255_v10 }
 0x1cf   :  { %v271_v12 = vmul.f32 %v539_v9, %v263_v11 }
 0x1d1   :  { %v279_v14 = vmul.f32 %v729_v62, %v271_v12 }
 0x1d3   :  { %466 = vmatmul.msk.f32.gmra.mxu1 %vm167_vm2, %v276_v13  ;;  %469 = vmatmul.msk.f32.gmra.mxu3 %vm167_vm2, %v279_v14 }
 0x221   :  { %v385_v59 = vpop.f32.mrf.mxu1 }
 0x222   :  { %v410_v53 = vsel %vm409_vm0, %v385_v59, 0.0 }
 0x223   :  { %418 = vst [vmem:[%s814_s1] sm:$0xff] %v410_v53 }
 0x229   :  { %v388_v15 = vpop.f32.mrf.mxu1 }
 0x22a   :  { %v411_v16 = vsel %vm409_vm0, %v388_v15, 0.0 }
 0x22b   :  { %419 = vst [vmem:[%s814_s1 + $0x8] sm:$0xff] %v411_v16 }
 0x237   :  { %v391_v51 = vpop.f32.mrf.mxu1 }
 0x238   :  { %v412_v62 = vsel %vm409_vm0, %v391_v51, 0.0 }
 0x239   :  { %420 = vst [vmem:[%s814_s1 + $0x10] sm:$0xff] %v412_v62 }
 0x246   :  { %v400_v17 = vpop.f32.mrf.mxu3 }
 0x247   :  { %v415_v18 = vsel %vm409_vm0, %v400_v17, 0.0 }
 0x248   :  { %423 = vst [vmem:[%s814_s1 + $0x28] sm:$0xff] %v415_v18  ;;  %v394_v19 = vpop.f32.mrf.mxu1 }
 0x249   :  { %v413_v20 = vsel %vm409_vm0, %v394_v19, 0.0 }
 0x24a   :  { %421 = vst [vmem:[%s814_s1 + $0x18] sm:$0xff] %v413_v20 }
 0x24e   :  { %v403_v21 = vpop.f32.mrf.mxu3 }
 0x24f   :  { %v416_v22 = vsel %vm409_vm0, %v403_v21, 0.0 }
 0x250   :  { %424 = vst [vmem:[%s814_s1 + $0x30] sm:$0xff] %v416_v22  ;;  %v397_v23 = vpop.f32.mrf.mxu1 }
 0x251   :  { %v414_v24 = vsel %vm409_vm0, %v397_v23, 0.0 }
 0x252   :  { %422 = vst [vmem:[%s814_s1 + $0x20] sm:$0xff] %v414_v24 }
 0x256   :  { %v406_v27 = vpop.f32.mrf.mxu3 }
 0x257   :  { %v417_v28 = vsel %vm409_vm0, %v406_v27, 0.0 }
 0x258   :  { %425 = vst [vmem:[%s814_s1 + $0x38] sm:$0xff] %v417_v28 }

</bundles_post_ra>
